<compile_context>
chip_gen: v7x
topology: tpu7x:2x2x1
jax: 0.10.0
libtpu: 0.0.40
codegen_flags: <defaults>
</compile_context>

<pallas_src>
import functools

import jax
import jax.numpy as jnp
from jax.experimental import pallas as pl
from jax.experimental.pallas import tpu as pltpu

EPS = 1e-5  # nn.InstanceNorm2d default eps


# ----------------------------- Pallas kernel --------------------------------
def _expanding_block_kernel(xp_ref, w_ref, b_ref, pm_ref, o_ref, *,
                            use_bn: bool, tile: int, inv_count: float):
    # xp_ref: (1, 4*Cin, T)     bf16  4-shift input patches, tile j of sample n
    # w_ref : (4*Cout, 4*Cin)   bf16  packed per-phase deconv weights
    # b_ref : (4*Cout, 1)       f32   bias replicated per phase
    # pm_ref: (4*Cout, 4*Cout)  f32   phase-pooling matrix (1 where same channel)
    # o_ref : (1, 4*Cout, HW)   f32   whole-sample output, VMEM-resident across tiles
    j = pl.program_id(1)

    # Conv-transpose for this spatial tile: MXU matmul with f32 accumulation.
    y = jnp.dot(w_ref[...], xp_ref[0], preferred_element_type=jnp.float32)
    y = y + b_ref[...]                                  # (4*Cout, T)

    start = pl.multiple_of(j * tile, tile)
    o_ref[0, :, pl.ds(start, tile)] = y                 # lane-dense store

    # Finalize once the whole sample is produced: InstanceNorm over the full Ho*Wo
    # extent (pool the 4 phase rows of each channel), then ReLU.
    @pl.when(j == pl.num_programs(1) - 1)
    def _finalize():
        yf = o_ref[0]                                   # (4*Cout, HW) f32
        if use_bn:
            s1 = jnp.sum(yf, axis=1, keepdims=True)     # per phase-row sums
            mean = jnp.dot(pm_ref[...], s1,
                           preferred_element_type=jnp.float32) * inv_count
            d = yf - mean
            s2 = jnp.sum(d * d, axis=1, keepdims=True)
            var = jnp.dot(pm_ref[...], s2,
                          preferred_element_type=jnp.float32) * inv_count
            yn = d * jax.lax.rsqrt(var + EPS)
        else:
            yn = yf
        o_ref[0] = jnp.maximum(yn, 0.0).astype(o_ref.dtype)


# ------------------------------- wrapper -------------------------------------
def _pick_tile(hw: int) -> int:
    # Largest multiple-of-128 divisor of hw (capped at 4096 lanes/step); prefer
    # splitting when possible so the pipelined multi-tile path is exercised.
    for t in (4096, 2048, 1024, 512, 256, 128):
        if t < hw and hw % t == 0:
            return t
    return hw  # block == full extent (always legal)


@functools.partial(jax.jit, static_argnames=("use_bn", "compute_dtype"))
def expanding_block(x_nchw, weight, bias, use_bn=True, compute_dtype=jnp.bfloat16):
    """Forward pass matching PyTorch ExpandingBlock.

    x_nchw: (N, Cin, H, W)
    weight: (Cin, Cout, 3, 3)   -- PyTorch ConvTranspose2d weight layout
    bias:   (Cout,)
    returns (N, Cout, 2H, 2W)
    """
    N, Cin, H, W = x_nchw.shape
    Cout = weight.shape[1]
    HW = H * W
    C4i, C4o = 4 * Cin, 4 * Cout

    # ---- 4-shift patches, built directly from NCHW (no layout transpose) -------
    xpad = jnp.pad(x_nchw, ((0, 0), (0, 0), (0, 1), (0, 1)))
    shifts = [xpad[:, :, sr:sr + H, sc:sc + W] for sr in (0, 1) for sc in (0, 1)]
    xp = jnp.concatenate(shifts, axis=1).reshape(N, C4i, HW).astype(compute_dtype)

    # ---- packed phase weight matrix (4*Cout, 4*Cin) -----------------------------
    # out[2r+dr, 2c+dc, co] = sum over valid shifts (sr,sc) and ci of
    #     x[r+sr, c+sc, ci] * W_T[ci, co, ky(dr,sr), kx(dc,sc)]
    def _tap(d, s):
        if d == 0:
            return 1 if s == 0 else None   # even output row/col: only tap ky=1
        return 2 if s == 0 else 0          # odd: shift 0 -> ky=2, shift 1 -> ky=0

    rows = []
    for dr in (0, 1):
        for dc in (0, 1):
            blocks = []
            for sr in (0, 1):
                for sc in (0, 1):
                    ky, kx = _tap(dr, sr), _tap(dc, sc)
                    if ky is None or kx is None:
                        blocks.append(jnp.zeros((Cout, Cin), jnp.float32))
                    else:
                        blocks.append(weight[:, :, ky, kx].T.astype(jnp.float32))
                    del ky, kx
            rows.append(jnp.concatenate(blocks, axis=1))        # (Cout, 4*Cin)
    w_mat = jnp.concatenate(rows, axis=0).astype(compute_dtype)  # (4*Cout, 4*Cin)

    b4 = jnp.tile(bias.astype(jnp.float32), 4).reshape(C4o, 1)
    idx = jnp.arange(C4o)
    pool = (idx[:, None] % Cout == idx[None, :] % Cout).astype(jnp.float32)

    # ---- fused matmul + InstanceNorm + ReLU in Pallas ---------------------------
    tile = _pick_tile(HW)
    nt = HW // tile
    kernel = functools.partial(_expanding_block_kernel, use_bn=use_bn,
                               tile=tile, inv_count=1.0 / (4.0 * HW))
    y = pl.pallas_call(
        kernel,
        out_shape=jax.ShapeDtypeStruct((N, C4o, HW), jnp.float32),
        grid_spec=pltpu.PrefetchScalarGridSpec(
            num_scalar_prefetch=0,
            grid=(N, nt),
            in_specs=[
                pl.BlockSpec((1, C4i, tile), lambda n, j: (n, 0, j)),
                pl.BlockSpec((C4o, C4i), lambda n, j: (0, 0)),
                pl.BlockSpec((C4o, 1), lambda n, j: (0, 0)),
                pl.BlockSpec((C4o, C4o), lambda n, j: (0, 0)),
            ],
            out_specs=pl.BlockSpec((1, C4o, HW), lambda n, j: (n, 0, 0)),
        ),
        compiler_params=pltpu.CompilerParams(
            dimension_semantics=("parallel", "arbitrary")),
    )(xp, w_mat, b4, pool)

    # (N, 4*Cout, H*W) -> NCHW via phase interleave (the only output-sized shuffle;
    # the old NHWC<->NCHW transposes are gone).
    y = y.reshape(N, 2, 2, Cout, H, W)            # (n, dr, dc, co, r, c)
    y = jnp.transpose(y, (0, 3, 4, 1, 5, 2))      # (n, co, r, dr, c, dc)
    return y.reshape(N, Cout, 2 * H, 2 * W)


# -------------------------- pure-JAX reference --------------------------------
def expanding_block_ref(x_nchw, weight, bias, use_bn=True, compute_dtype=jnp.bfloat16):
    # Same math, same operand quantization (bf16 operands, f32 accumulation).
    Cout = weight.shape[1]
    x = jnp.transpose(x_nchw, (0, 2, 3, 1)).astype(compute_dtype)
    w_conv = jnp.flip(jnp.transpose(weight, (2, 3, 0, 1)),
                      axis=(0, 1)).astype(compute_dtype)
    y = jax.lax.conv_general_dilated(
        x, w_conv, window_strides=(1, 1), padding=((1, 2), (1, 2)),
        lhs_dilation=(2, 2), dimension_numbers=("NHWC", "HWIO", "NHWC"),
        preferred_element_type=jnp.float32)
    y = y + bias.reshape(1, 1, 1, Cout).astype(jnp.float32)
    if use_bn:
        mean = jnp.mean(y, axis=(1, 2), keepdims=True)
        var = jnp.mean((y - mean) ** 2, axis=(1, 2), keepdims=True)
        y = (y - mean) * jax.lax.rsqrt(var + EPS)
    y = jnp.maximum(y, 0.0)
    return jnp.transpose(y, (0, 3, 1, 2))


if __name__ == "__main__":
    # small shapes: batch=2, input_channels=4, spatial=16x16
    N, Cin, H, W = 2, 4, 16, 16
    Cout = Cin // 2

    key = jax.random.PRNGKey(0)
    kx, kw, kb = jax.random.split(key, 3)
    x = jax.random.normal(kx, (N, Cin, H, W), jnp.float32)

    # deterministic ConvTranspose2d-style init (uniform in +/- 1/sqrt(fan_in))
    bound = 1.0 / (Cin * 3 * 3) ** 0.5
    weight = jax.random.uniform(kw, (Cin, Cout, 3, 3), jnp.float32, -bound, bound)
    bias = jax.random.uniform(kb, (Cout,), jnp.float32, -bound, bound)

    ok = True
    for use_bn in (True, False):
        out = expanding_block(x, weight, bias, use_bn=use_bn)
        out = jax.block_until_ready(out)
        assert out.shape == (N, Cout, 2 * H, 2 * W), out.shape
        ref = expanding_block_ref(x, weight, bias, use_bn=use_bn)
        err = float(jnp.max(jnp.abs(out - ref)))
        assert jnp.allclose(out, ref, rtol=2e-3, atol=2e-3), (use_bn, err)

    if ok:
        print("KERNEL_OK")
</pallas_src>

<mosaic_0001>
module attributes {stable_mosaic.version = 11 : i64} {
  func.func @_expanding_block_kernel(%arg0: i32, %arg1: i32, %arg2: memref<1x16x128xbf16, #tpu.memory_space<vmem>>, %arg3: memref<8x16xbf16, #tpu.memory_space<vmem>>, %arg4: memref<8x1xf32, #tpu.memory_space<vmem>>, %arg5: memref<8x8xf32, #tpu.memory_space<vmem>>, %arg6: memref<1x8x256xf32, #tpu.memory_space<vmem>>) attributes {dimension_semantics = [#tpu.dimension_semantics<parallel>, #tpu.dimension_semantics<arbitrary>], iteration_bounds = array<i64: 2, 2>, scalar_prefetch = 0 : i64, scratch_operands = 0 : i64, tpu.core_type = #tpu.core_type<tc>, window_params = [{transform_indices = @transform_0, window_bounds = array<i64: 1, 16, 128>}, {pipeline_mode = #tpu.pipeline_mode<synchronous>, transform_indices = @transform_1, window_bounds = array<i64: 8, 16>}, {pipeline_mode = #tpu.pipeline_mode<synchronous>, transform_indices = @transform_2, window_bounds = array<i64: 8, 1>}, {pipeline_mode = #tpu.pipeline_mode<synchronous>, transform_indices = @transform_3, window_bounds = array<i64: 8, 8>}, {transform_indices = @transform_4, window_bounds = array<i64: 1, 8, 256>}]} {
    %c0 = arith.constant 0 : index
    %c0_0 = arith.constant 0 : index
    %0 = vector.load %arg3[%c0, %c0_0] : memref<8x16xbf16, #tpu.memory_space<vmem>>, vector<8x16xbf16>
    %c0_1 = arith.constant 0 : index
    %c0_2 = arith.constant 0 : index
    %c0_3 = arith.constant 0 : index
    %1 = vector.load %arg2[%c0_1, %c0_2, %c0_3] : memref<1x16x128xbf16, #tpu.memory_space<vmem>>, vector<1x16x128xbf16>
    %2 = vector.shape_cast %1 : vector<1x16x128xbf16> to vector<16x128xbf16>
    %cst = arith.constant dense<0.000000e+00> : vector<8x128xf32>
    %3 = tpu.matmul %0, %2, %cst {dimension_numbers = #tpu.dot_dimension_numbers<[1], [0], [0], [1], [0, 0, 1, 1], [], []>} : vector<8x16xbf16>, vector<16x128xbf16>, vector<8x128xf32> -> vector<8x128xf32>
    %c0_4 = arith.constant 0 : index
    %c0_5 = arith.constant 0 : index
    %4 = vector.load %arg4[%c0_4, %c0_5] : memref<8x1xf32, #tpu.memory_space<vmem>>, vector<8x1xf32>
    %5 = vector.broadcast %4 : vector<8x1xf32> to vector<8x128xf32>
    %6 = arith.addf %3, %5 : vector<8x128xf32>
    %c128_i32 = arith.constant 128 : i32
    %7 = arith.muli %arg1, %c128_i32 : i32
    %8 = tpu.assume_multiple %7, 128 : i32
    %c0_6 = arith.constant 0 : index
    %c0_7 = arith.constant 0 : index
    %9 = arith.index_cast %8 : i32 to index
    %10 = vector.load %arg6[%c0_6, %c0_7, %9] : memref<1x8x256xf32, #tpu.memory_space<vmem>>, vector<1x8x128xf32>
    %11 = vector.shape_cast %10 : vector<1x8x128xf32> to vector<8x128xf32>
    %12 = vector.shape_cast %6 : vector<8x128xf32> to vector<1x8x128xf32>
    tpu.vector_store %arg6[%c0_6, %c0_7, %9], %12 {strides = array<i32>} : memref<1x8x256xf32, #tpu.memory_space<vmem>>, vector<1x8x128xf32>,
    %c1_i32 = arith.constant 1 : i32
    %13 = arith.cmpi eq, %arg1, %c1_i32 : i32
    %14 = arith.extui %13 : i1 to i32
    %c0_i32 = arith.constant 0 : i32
    %15 = arith.cmpi ne, %14, %c0_i32 : i32
    scf.if %15 {
      %c0_8 = arith.constant 0 : index
      %c0_9 = arith.constant 0 : index
      %c0_10 = arith.constant 0 : index
      %16 = vector.load %arg6[%c0_8, %c0_9, %c0_10] : memref<1x8x256xf32, #tpu.memory_space<vmem>>, vector<1x8x256xf32>
      %17 = vector.shape_cast %16 : vector<1x8x256xf32> to vector<8x256xf32>
      %cst_11 = arith.constant dense<0.000000e+00> : vector<8xf32>
      %18 = vector.multi_reduction <add>, %17, %cst_11 [1] : vector<8x256xf32> to vector<8xf32>
      %19 = vector.shape_cast %18 : vector<8xf32> to vector<8x1xf32>
      %c0_12 = arith.constant 0 : index
      %c0_13 = arith.constant 0 : index
      %20 = vector.load %arg5[%c0_12, %c0_13] : memref<8x8xf32, #tpu.memory_space<vmem>>, vector<8x8xf32>
      %cst_14 = arith.constant dense<0.000000e+00> : vector<8x1xf32>
      %21 = tpu.matmul %20, %19, %cst_14 {dimension_numbers = #tpu.dot_dimension_numbers<[1], [0], [0], [1], [0, 0, 1, 1], [], []>} : vector<8x8xf32>, vector<8x1xf32>, vector<8x1xf32> -> vector<8x1xf32>
      %cst_15 = arith.constant 9.765625E-4 : f32
      %22 = vector.broadcast %cst_15 : f32 to vector<8x1xf32>
      %23 = arith.mulf %21, %22 : vector<8x1xf32>
      %24 = vector.broadcast %23 : vector<8x1xf32> to vector<8x256xf32>
      %25 = arith.subf %17, %24 : vector<8x256xf32>
      %26 = arith.mulf %25, %25 : vector<8x256xf32>
      %cst_16 = arith.constant dense<0.000000e+00> : vector<8xf32>
      %27 = vector.multi_reduction <add>, %26, %cst_16 [1] : vector<8x256xf32> to vector<8xf32>
      %28 = vector.shape_cast %27 : vector<8xf32> to vector<8x1xf32>
      %c0_17 = arith.constant 0 : index
      %c0_18 = arith.constant 0 : index
      %29 = vector.load %arg5[%c0_17, %c0_18] : memref<8x8xf32, #tpu.memory_space<vmem>>, vector<8x8xf32>
      %cst_19 = arith.constant dense<0.000000e+00> : vector<8x1xf32>
      %30 = tpu.matmul %29, %28, %cst_19 {dimension_numbers = #tpu.dot_dimension_numbers<[1], [0], [0], [1], [0, 0, 1, 1], [], []>} : vector<8x8xf32>, vector<8x1xf32>, vector<8x1xf32> -> vector<8x1xf32>
      %cst_20 = arith.constant 9.765625E-4 : f32
      %31 = vector.broadcast %cst_20 : f32 to vector<8x1xf32>
      %32 = arith.mulf %30, %31 : vector<8x1xf32>
      %cst_21 = arith.constant 9.99999974E-6 : f32
      %33 = vector.broadcast %cst_21 : f32 to vector<8x1xf32>
      %34 = arith.addf %32, %33 : vector<8x1xf32>
      %35 = math.rsqrt %34 : vector<8x1xf32>
      %36 = vector.broadcast %35 : vector<8x1xf32> to vector<8x256xf32>
      %37 = arith.mulf %25, %36 : vector<8x256xf32>
      %cst_22 = arith.constant 0.000000e+00 : f32
      %38 = vector.broadcast %cst_22 : f32 to vector<8x256xf32>
      %39 = arith.maximumf %37, %38 : vector<8x256xf32>
      %c0_23 = arith.constant 0 : index
      %c0_24 = arith.constant 0 : index
      %c0_25 = arith.constant 0 : index
      %40 = vector.load %arg6[%c0_23, %c0_24, %c0_25] : memref<1x8x256xf32, #tpu.memory_space<vmem>>, vector<1x8x256xf32>
      %41 = vector.shape_cast %40 : vector<1x8x256xf32> to vector<8x256xf32>
      %42 = vector.shape_cast %39 : vector<8x256xf32> to vector<1x8x256xf32>
      tpu.vector_store %arg6[%c0_23, %c0_24, %c0_25], %42 {strides = array<i32>} : memref<1x8x256xf32, #tpu.memory_space<vmem>>, vector<1x8x256xf32>,
    } else {
    }
    return
  }
  func.func @transform_0(%arg0: i32, %arg1: i32) -> (i32, i32, i32) {
    %c0_i32 = arith.constant 0 : i32
    %c0_i32_0 = arith.constant 0 : i32
    return %arg0, %c0_i32, %arg1 : i32, i32, i32
  }
  func.func @transform_1(%arg0: i32, %arg1: i32) -> (i32, i32) {
    %c0_i32 = arith.constant 0 : i32
    %c0_i32_0 = arith.constant 0 : i32
    %c0_i32_1 = arith.constant 0 : i32
    return %c0_i32, %c0_i32_0 : i32, i32
  }
  func.func @transform_2(%arg0: i32, %arg1: i32) -> (i32, i32) {
    %c0_i32 = arith.constant 0 : i32
    %c0_i32_0 = arith.constant 0 : i32
    %c0_i32_1 = arith.constant 0 : i32
    return %c0_i32, %c0_i32_0 : i32, i32
  }
  func.func @transform_3(%arg0: i32, %arg1: i32) -> (i32, i32) {
    %c0_i32 = arith.constant 0 : i32
    %c0_i32_0 = arith.constant 0 : i32
    %c0_i32_1 = arith.constant 0 : i32
    return %c0_i32, %c0_i32_0 : i32, i32
  }
  func.func @transform_4(%arg0: i32, %arg1: i32) -> (i32, i32, i32) {
    %c0_i32 = arith.constant 0 : i32
    %c0_i32_0 = arith.constant 0 : i32
    %c0_i32_1 = arith.constant 0 : i32
    return %arg0, %c0_i32, %c0_i32_0 : i32, i32, i32
  }
}

</mosaic_0001>

<bundles_post_ra>
// kernel: tile.8
= control target key start
LH: loop header
LB: loop body
LE: loop exit
PB: predicated region body
PF: predicated region fallthrough
CT: control target
= control target key end

     0   :  { %2 = vsyncpa [#allocation1], 0  ;;  %s44_s6 = smov [#allocation0]   ;;  %s70_s0 = inlined_call_operand.hbm [shape: f32[2], index: 0, kind: input, shape index: {}]   ;;  %s71_s1 = inlined_call_operand.vmem [shape: f32[4,2], index: 1, kind: output, shape index: {}]  }
   0x1   :  { %s9_s7 = sshll.u32 %s44_s6, 4  ;;  %s20_s10 = scalar_lea.hbm %s70_s0, 16  ;;  %s10_s7 = int_to_ptr.vmem [resolvable:$true] %s9_s7 }
   0x2   :  { %p21_p0 = scmp.ne.s32.totalorder %s70_s0, %s20_s10  ;;  %p24_p1 = scmp.lt.u32.totalorder %s20_s10, %s70_s0 }
   0x4   :  { %p26_p2 = pnand %p24_p1, %p21_p0 }
   0x6   :  { %29 = shalt.err (!%p26_p2)
}
   0x7   :  { %s30_s15 = scalar_lea.vmem %s10_s7, 16  ;;  %s34_s16 = scalar_lea.vmem %s10_s7, 32 }
   0x8   :  { %p31_p3 = scmp.ne.s32.totalorder %s10_s7, %s30_s15  ;;  %p35_p4 = scmp.lt.s32.totalorder %s10_s7, %s10_s7 }
   0x9   :  { %p36_p5 = scmp.lt.s32.totalorder %s34_s16, %s30_s15 }
   0xb   :  { %p37_p6 = por %p36_p5, %p35_p4 }
   0xd   :  { %p38_p7 = pnand %p37_p6, %p31_p3 }
   0xf   :  { %41 = shalt.err (!%p38_p7)
}
  0x10   :  { %12 = dma.hbm_to_vmem [thread:$0]  %s70_s0, 16, %s10_s7, [#allocation1]  }
  0x11   :  { %42 = dma.done.wait [#allocation1], 16  }
  0x12   :  { %43 = vsyncadd [#allocation1], 4294967280  ;;  %v16_v0 = vld [vmem:[#allocation0] ss:$0 sm:$0xff] }
  0x13   :  { %17 = vst [vmem:[%s71_s1] sm:$0xf] %v16_v0 }
  0x14   :  { %18 = vsyncpa [#allocation1], 1 }

// kernel: tile.0
= control target key start
LH: loop header
LB: loop body
LE: loop exit
PB: predicated region body
PF: predicated region fallthrough
CT: control target
= control target key end

     0   :  { %vm7_vm0 = vcmask 7168   ;;  %s37_s0 = inlined_call_operand.vmem [shape: f32[4,2], index: 0, kind: input, shape index: {}]   ;;  %s38_s1 = inlined_call_operand.vmem [shape: f32[8,1], index: 1, kind: output, shape index: {}]  }
   0x1   :  { %v4_v0 = vld [vmem:[%s37_s0] sm:$0xf]  ;;  %s17_s0 = smov 127  }
   0x2   :  { %5 = vst [vmem:[#allocation0] sm:$0xf] %v4_v0 }
   0x9   :  { %v9_v1 = vld [vmem:[#allocation0] sm:$0xf]  }
   0xa   :  { %v6_v2 = vld [vmem:[#allocation0] sm:$0xf]   ;;  %10 = vrot.lane.b32.xlu0 %v9_v1, %s17_s0 }
   0xb   :  { %8 = vst.msk [vmem:[%s38_s1] ss:$2 sm:$0xf] %vm7_vm0, %v6_v2  }
  0x7c   :  { %v11_v3 = vpop.permute.xlu0 %10  }
  0x7d   :  { %15 = vst.msk [vmem:[%s38_s1 + $0x1] ss:$2 sm:$0xf] %vm7_vm0, %v11_v3  }

// kernel: expanding_block.1
= control target key start
LH: loop header
LB: loop body
LE: loop exit
PB: predicated region body
PF: predicated region fallthrough
CT: control target
= control target key end

     0   :  { %s780_s15 = smov 0   ;;  %s782_s16 = smov 0   ;;  %s889_s0 = inlined_call_operand.vmem [shape: bf16[2,16,256], index: 0, kind: input, shape index: {}]   ;;  %s890_s1 = inlined_call_operand.vmem [shape: bf16[8,16], index: 1, kind: input, shape index: {}]   ;;  %s891_s2 = inlined_call_operand.vmem [shape: f32[8,1], index: 2, kind: input, shape index: {}]   ;;  %s892_s3 = inlined_call_operand.vmem [shape: f32[8,8], index: 3, kind: input, shape index: {}]   ;;  %s893_s4 = inlined_call_operand.vmem [shape: f32[2,8,256], index: 4, kind: output, shape index: {}]  }
   0x1   :  { %s784_s17 = smov 0   ;;  %s786_s18 = smov 0  }
   0x2   :  { %s788_s19 = smov 0   ;;  %s790_s20 = smov 0  }
   0x3   :  { %s792_s21 = smov 0  }
   0x4 LB: > { %s23_s22 = sadd.s32 1, %s739_s19  ;;  %s26_s23 = sadd.s32 1, %s743_s20  ;;  %s747_s21 = sphi %s792_s21, %s14_s21   ;;  %s743_s20 = sphi %s790_s20, %s899_s20   ;;  %s739_s19 = sphi %s788_s19, %s898_s19   ;;  %s735_s18 = sphi %s786_s18, %s897_s18   ;;  %s731_s17 = sphi %s784_s17, %s896_s17   ;;  %s727_s16 = sphi %s782_s16, %s895_s16   ;;  %s723_s15 = sphi %s780_s15, %s894_s15  }
   0x5   : > { %p24_p0 = scmp.ge.s32.totalorder %s23_s22, 2  ;;  %p42_p1 = scmp.ne.s32.totalorder %s727_s16, %s723_s15 }
   0x6   : > { %p43_p2 = scmp.eq.s32.totalorder %s747_s21, 0  ;;  %s35_s27 = sadd.s32 1, %s727_s16 }
   0x7   : > { %s901_s22 = smov (%p24_p0, %s23_s22), 0  ;;  %s903_s23 = smov (!%p24_p0, %s26_s23), %s743_s20 }
   0x8   : > { %p44_p3 = por %p43_p2, %p42_p1  ;;  %p28_p4 = scmp.ge.s32.totalorder %s903_s23, 2 }
   0x9   : > { %s31_s24 = ssub.s32 %s739_s19, %s901_s22  ;;  %p585_p6 = scmp.ge.s32.totalorder %s747_s21, 4 }
   0xa   : > { %s905_s23 = smov (%p28_p4, %s903_s23), 0 }
   0xb   : > { %s30_s25 = ssub.s32 %s743_s20, %s905_s23  ;;  %166 = sbr.rel (%p585_p6) target bundleno = 25 (0x19), region = 28 }
   0xc   : > { %s32_s26 = sor.u32 %s31_s24, %s30_s25 }
   0xd   : > { %p33_p5 = scmp.eq.s32.totalorder %s32_s26, 0 }
   0xf   : > { %s831_s28 = scalar_select %p33_p5, %s727_s16, %s35_s27  }
  0x12   : > { %169 = sbr.rel (!%p44_p3) target bundleno = 25 (0x19), region = 32  ;;  %s171_s29 = sand.u32 (%p44_p3), 1, %s727_s16  }
  0x13   : > { %s587_s30 = sshll.u32 (%p44_p3), %s743_s20, 2  ;;  %s586_s5 = sshll.u32 (%p44_p3), %s171_s29, 3 }
  0x14   : > { %s175_s6 = sadd.s32 (%p44_p3), %s739_s19, %s587_s30  ;;  %s173_s11 = scalar_lea.vmem (%p44_p3), [#allocation2], %s586_s5 }
  0x15   : > { %s588_s7 = sshll.u32 (%p44_p3), %s175_s6, 2 }
  0x16   : > { %s177_s10 = scalar_lea.vmem (%p44_p3), %s889_s0, %s588_s7 }
  0x17   : > { %v193_v0 = vld [vmem:[%s177_s10] sm:$0xf] (%p44_p3)  ;;  %v195_v1 = vld [vmem:[%s177_s10 + $0x8] sm:$0xf] (%p44_p3) }
  0x18   : > { %194 = vst [vmem:[%s173_s11] sm:$0xf] (%p44_p3), %v193_v0  ;;  %196 = vst [vmem:[%s173_s11 + $0x4] sm:$0xf] (%p44_p3), %v195_v1 }
  0x19 PF: > { %p589_p7 = scmp.ge.s32.totalorder %s747_s21, 1  ;;  %p222_p8 = scmp.lt.s32.totalorder %s747_s21, 5 }
  0x1b   : > { %p223_p9 = pnand %p589_p7, %p222_p8 }
  0x1c   : > { %s229_s12 = sand.u32 (!%p223_p9), 1, %s723_s15   ;;  %v749_v2 = vmov (!%p223_p9), 0.0   ;;  %vm750_vm0 = vmmov (!%p223_p9), 0   ;;  %v263_v3 = vld [vmem:[%s891_s2] sm:$0xff] (!%p223_p9)  ;;  %v751_v4 = vmov (!%p223_p9), 0   ;;  %vm275_vm1 = vcmask (!%p223_p9), 130048  }
  0x1d   : > { %226 = sbr.rel (%p223_p9) target bundleno = 1253 (0x4e5), region = 73  ;;  %609 = vmatprep.subr.bf16.mxu0 (!%p223_p9), %v749_v2  ;;  %s590_s13 = sshll.u32 (!%p223_p9), %s229_s12, 3  ;;  %611 = vmatprep.mubr.msk.bf16.mxu0 (!%p223_p9), %vm750_vm0, %v749_v2  ;;  %v260_v6 = vld [vmem:[%s890_s1] sm:$0xf] (!%p223_p9) }
  0x1e   : > { %687 = vset.pattern.permute.xlu0 (!%p223_p9), %v751_v4  ;;  %s231_s25 = scalar_lea.vmem (!%p223_p9), [#allocation2], %s590_s13  ;;  %p254_p10 = scmp.lt.s32.totalorder (!%p223_p9), %s735_s18, 1 }
  0x1f   : > { %v688_v5 = vld [vmem:[%s231_s25] sm:$0xff] (!%p223_p9)   ;;  %266 = vperm.xlu0 (!%p223_p9), %687, %v263_v3   ;;  %s595_s27 = sshll.u32 (!%p223_p9), %s731_s17, 7  ;;  %p597_p11 = scmp.ne.s32.totalorder (!%p223_p9), %s731_s17, 1 }
  0x20   : > { %610 = vmatpush3.bf16.msra.mxu0 (!%p223_p9), %v688_v5  ;;  %s320_s30 = sshra.s32 (!%p223_p9), %s595_s27, 7 }
  0x21   : > { %s596_s8 = sshll.u32 (!%p223_p9), %s320_s30, 3 }
  0x23   : > { %612 = vmatmul.mubr.msk.bf16.vlgmr.msra.gmra.mrb[0].mxu0 (!%p223_p9), %vm275_vm1, %v260_v6 }
  0x24   : > { %s907_s18 = smov (!%p254_p10, %s735_s18), 1  ;;  %v752_v16 = vmov (!%p597_p11), 0.0   ;;  %vm753_vm2 = vmmov (!%p597_p11), 0   ;;  %v334_v17 = vld [vmem:[%s892_s3] sm:$0xff] (!%p597_p11)  ;;  %vm335_vm3 = vcmask (!%p597_p11), 64512   ;;  %v754_v19 = vmov (!%p597_p11), 0  }
  0x25   : > { %s602_s29 = sshll.u32 %s907_s18, 4  ;;  %615 = vmatprep.subr.mxu0 (!%p597_p11), %v752_v16  ;;  %620 = vmatprep.subr.mxu1 (!%p597_p11), %v752_v16 }
  0x26   : > { %s855_s7 = scalar_lea.vmem %s893_s4, %s602_s29  ;;  %617 = vmatprep.mubr.msk.f32.mxu0 (!%p597_p11), %vm753_vm2, %v752_v16  ;;  %622 = vmatprep.mubr.msk.f32.mxu1 (!%p597_p11), %vm753_vm2, %v752_v16 }
  0x27   : > { %s323_s9 = scalar_lea.vmem %s855_s7, %s596_s8  ;;  %689 = vset.pattern.permute.xlu0 (!%p597_p11), %v754_v19  ;;  %690 = vset.pattern.permute.xlu1 (!%p597_p11), %v754_v19 }
  0x9e   : > { %v267_v7 = vpop.permute.xlu0 %266 }
  0xf3   : > { %328 = sbr.rel (%p597_p11) target bundleno = 1253 (0x4e5), region = 81 }
  0xf6   : > { %v313_v8 = vpop.f32.mrb[0].mxu0 }
  0xf7   : > { %v314_v9 = vadd.f32 %v313_v8, %v267_v7  ;;  %v613_v10 = vpop.f32.mrb[1].mxu0 }
  0xf8   : > { %v316_v11 = vpop.f32.mrb[2].mxu0 }
  0xf9   : > { %324 = vst [vmem:[%s323_s9] sm:$0xff] %v314_v9  ;;  %v614_v12 = vpop.f32.mrb[3].mxu0 }
 0x100   : > { %v329_v13 = vld [vmem:[%s855_s7] sm:$0xff]  ;;  %v330_v14 = vld [vmem:[%s855_s7 + $0x8] sm:$0xff] }
 0x101   : > { %v331_v15 = vadd.f32 %v330_v14, %v329_v13 }
 0x103   : > { %332 = vadd.xlane.f32.xlu0 %v331_v15 }
 0x190   : > { %v333_v18 = vpop.xlane.xlu0 %332 }
 0x191   : > { %616 = vmatpush3.msra.mxu0 %v333_v18 }
 0x192   : > { %618 = vmatmul.mubr.msk.f32.vlgmr.msra.gmra.mrb[0].mxu0 %vm335_vm3, %v334_v17 }
 0x265   : > { %v405_v20 = vpop.f32.mrb[0].mxu0 }
 0x266   : > { %v409_v21 = vmul.f32 0.0009765625, %v405_v20  ;;  %v619_v22 = vpop.f32.mrb[1].mxu0 }
 0x268   : > { %412 = vperm.xlu0 %689, %v409_v21  }
 0x2e7   : > { %v413_v23 = vpop.permute.xlu0 %412 }
 0x2e8   : > { %v415_v24 = vsub.f32 %v329_v13, %v413_v23  ;;  %v416_v25 = vsub.f32 %v330_v14, %v413_v23 }
 0x2ea   : > { %v417_v26 = vmul.f32 %v415_v24, %v415_v24  ;;  %v418_v27 = vmul.f32 %v416_v25, %v416_v25 }
 0x2ec   : > { %v419_v28 = vadd.f32 %v418_v27, %v417_v26 }
 0x2ee   : > { %420 = vadd.xlane.f32.xlu1 %v419_v28 }
 0x37b   : > { %v421_v29 = vpop.xlane.xlu1 %420 }
 0x37c   : > { %621 = vmatpush3.msra.mxu1 %v421_v29 }
 0x37d   : > { %623 = vmatmul.mubr.msk.f32.vlgmr.msra.gmra.mrb[0].mxu1 %vm335_vm3, %v334_v17 }
 0x450   : > { %v488_v30 = vpop.f32.mrb[0].mxu1 }
 0x451   : > { %v492_v31 = vmul.f32 0.0009765625, %v488_v30  ;;  %v624_v32 = vpop.f32.mrb[1].mxu1 }
 0x453   : > { %v493_v33 = vadd.f32 1e-05, %v492_v31 }
 0x455   : > { %691 = vrsqrt.f32 %v493_v33 }
 0x45f   : > { %v692_v34 = vpop.eup %691 }
 0x460   : > { %497 = vperm.xlu1 %690, %v692_v34  }
 0x4df   : > { %v498_v35 = vpop.permute.xlu1 %497 }
 0x4e0   : > { %v500_v36 = vmul.f32 %v498_v35, %v415_v24  ;;  %v501_v37 = vmul.f32 %v498_v35, %v416_v25 }
 0x4e2   : > { %v502_v38 = vmax.f32 %v500_v36, 0.0  ;;  %v503_v39 = vmax.f32 %v501_v37, 0.0 }
 0x4e4   : > { %504 = vst [vmem:[%s855_s7] sm:$0xff] %v502_v38  ;;  %505 = vst [vmem:[%s855_s7 + $0x8] sm:$0xff] %v503_v39 }
 0x4e5 PF: > { %s14_s21 = sadd.s32 1, %s747_s21   ;;  %s894_s15 = smov %s727_s16 }
 0x4e6   : > { %p11_p12 = scmp.ge.s32.totalorder %s14_s21, 6   ;;  %s895_s16 = smov %s831_s28 }
 0x4e7   : > { %s896_s17 = smov %s739_s19  ;;  %s897_s18 = smov %s743_s20 }
 0x4e8   : > { %s898_s19 = smov %s901_s22  ;;  %s899_s20 = smov %s905_s23 }
 0x4e9   :  { %13 = sbr.rel (!%p11_p12) target bundleno = 4 (0x4), region = 117 }

</bundles_post_ra>
